<compile_context>
chip_gen: v7x
topology: tpu7x:2x2x1
jax: 0.10.0
libtpu: 0.0.40
codegen_flags: <defaults>
</compile_context>

<pallas_src>
import jax
import jax.numpy as jnp
from jax.experimental import pallas as pl
from jax.experimental.pallas import tpu as pltpu

LANE = 128


def _round_up(x, m):
    return ((x + m - 1) // m) * m


def _vmem_limit_bytes():
    """Generation-aware scoped-VMEM cap (conservative fallback: v7x per-TC)."""
    cap = 64 * 1024 * 1024
    try:
        cap = int(pltpu.get_tpu_info().vmem_capacity_bytes)
    except Exception:
        pass
    return min(int(cap * 0.8), 100 * 1024 * 1024)


def _largest_tile(n, cap):
    """Largest multiple of LANE that divides n and is <= cap."""
    best = LANE
    t = LANE
    while t <= min(cap, n):
        if n % t == 0:
            best = t
        t += LANE
    return best


def _pad2d(x, rows, cols, dtype):
    """Zero-pad/cast to (rows, cols, dtype); no-op if already aligned."""
    if x.shape == (rows, cols) and x.dtype == dtype:
        return x
    out = jnp.zeros((rows, cols), dtype)
    return out.at[:x.shape[0], :x.shape[1]].set(x.astype(dtype))


def pad_graph(G, *, tm=256, dtype=jnp.bfloat16):
    """Pad + cast the (static) hypergraph matrix once; reuse across layers.

    Pass the result as `G` to hgnn_conv with the same tm/compute_dtype and the
    per-forward host-side pad/cast copy is skipped entirely."""
    n = G.shape[0]
    return _pad2d(G, _round_up(n, max(tm, LANE)), _round_up(n, LANE),
                  jnp.dtype(dtype))


# ---------------------------------------------------------------------------
# Phase 1: h = relu(X @ Wt + b), tiled over row blocks (bias+ReLU done once).
# ---------------------------------------------------------------------------
def _linear_relu_kernel(x_ref, w_ref, b_ref, h_ref):
    acc = jnp.dot(x_ref[...], w_ref[...], preferred_element_type=jnp.float32)
    acc = jnp.maximum(acc + b_ref[...], 0.0)
    h_ref[...] = acc.astype(h_ref.dtype)


# ---------------------------------------------------------------------------
# Phase 2: out = G @ h.
# ---------------------------------------------------------------------------
def _propagate_resident_kernel(g_ref, h_ref, o_ref):
    # h fully VMEM-resident: one MXU matmul per row tile, G read exactly once.
    o_ref[...] = jnp.dot(g_ref[...], h_ref[...],
                         preferred_element_type=jnp.float32).astype(o_ref.dtype)


def _propagate_acc_out_kernel(g_ref, h_ref, o_ref):
    # Fallback (tiled k), f32 output: accumulate directly into the resident
    # output block -- no VMEM scratch needed.
    @pl.when(pl.program_id(1) == 0)
    def _init():
        o_ref[...] = jnp.zeros_like(o_ref)

    o_ref[...] += jnp.dot(g_ref[...], h_ref[...],
                          preferred_element_type=jnp.float32)


def _propagate_scratch_kernel(g_ref, h_ref, o_ref, acc_ref):
    # Fallback (tiled k), non-f32 output: f32 accumulator in VMEM scratch.
    @pl.when(pl.program_id(1) == 0)
    def _init():
        acc_ref[...] = jnp.zeros_like(acc_ref)

    acc_ref[...] += jnp.dot(g_ref[...], h_ref[...],
                            preferred_element_type=jnp.float32)

    @pl.when(pl.program_id(1) == pl.num_programs(1) - 1)
    def _fin():
        o_ref[...] = acc_ref[...].astype(o_ref.dtype)


def hgnn_conv(feats, weight, bias, G, *, tm=256, tk=512,
              compute_dtype=jnp.bfloat16):
    """feats: [N, dim_in]; weight: [dim_out, dim_in] (PyTorch convention);
    bias: [dim_out]; G: raw [N, N] or pre-padded via pad_graph(G, tm, dtype).
    Returns [N, dim_out] in feats.dtype.

    compute_dtype: matmul operand dtype (bf16 default; MXU accumulates in f32).
    tm: output row tile; tk: reduction tile (only used if h can't stay resident)."""
    N, dim_in = feats.shape
    dim_out = weight.shape[0]
    out_dtype = feats.dtype
    out_itemsize = jnp.dtype(out_dtype).itemsize
    cdt = jnp.dtype(compute_dtype)
    vmem_limit = _vmem_limit_bytes()

    # Lane-dense feature dims.
    d_in_pad = _round_up(dim_in, LANE)
    d_out_pad = _round_up(dim_out, LANE)

    # Per-tile node padding only (no lcm blow-up of G).
    tm = max(LANE, _round_up(min(tm, _round_up(N, LANE)), LANE))
    n_row_pad = _round_up(N, tm)

    # Residency check: can h (plus a double-buffered G row tile and the output
    # tile) live in VMEM for the whole propagation?
    n_col_min = _round_up(N, LANE)
    resident_need = (2 * n_col_min * d_out_pad * cdt.itemsize      # h (x2)
                     + 2 * tm * n_col_min * cdt.itemsize           # G tile (x2)
                     + 2 * tm * d_out_pad * out_itemsize)          # out tile (x2)
    h_resident = resident_need <= int(0.7 * vmem_limit)

    if h_resident:
        n_col_pad = n_col_min
    else:
        tk = max(LANE, _round_up(min(tk, n_col_min), LANE))
        n_col_pad = _round_up(N, tk)

    # --- padding / casts (zero padding; padded G columns MUST stay zero so the
    # nonzero padded h rows (= relu(bias)) never contribute).
    x_pad = _pad2d(feats, n_col_pad, d_in_pad, cdt)
    w_pad = _pad2d(weight.T, d_in_pad, d_out_pad, cdt)
    b_pad = jnp.zeros((1, d_out_pad), jnp.float32
                      ).at[0, :dim_out].set(bias.astype(jnp.float32))
    if G.shape[0] > n_row_pad or G.shape[1] > n_col_pad:
        raise ValueError(
            f"pre-padded G {G.shape} exceeds the tile plan "
            f"({n_row_pad}, {n_col_pad}); re-run pad_graph with matching tm/dtype")
    g_pad = _pad2d(G, n_row_pad, n_col_pad, cdt)   # no-op if pre-padded+cast

    # ------------------------- Phase 1: linear + ReLU -----------------------
    th = _largest_tile(n_col_pad, cap=1024)   # X tile is tiny -> big row tiles
    h_pad = pl.pallas_call(
        _linear_relu_kernel,
        out_shape=jax.ShapeDtypeStruct((n_col_pad, d_out_pad), cdt),
        grid_spec=pltpu.PrefetchScalarGridSpec(
            num_scalar_prefetch=0,
            grid=(n_col_pad // th,),
            in_specs=[
                pl.BlockSpec((th, d_in_pad), lambda i: (i, 0)),
                # W kept whole (bf16, small for typical HGNN dims); block over
                # d_in only if d_in_pad*d_out_pad grows past a few MiB.
                pl.BlockSpec((d_in_pad, d_out_pad), lambda i: (0, 0)),
                pl.BlockSpec((1, d_out_pad), lambda i: (0, 0)),
            ],
            out_specs=pl.BlockSpec((th, d_out_pad), lambda i: (i, 0)),
        ),
        compiler_params=pltpu.CompilerParams(
            dimension_semantics=("parallel",),
            vmem_limit_bytes=vmem_limit,
        ),
        cost_estimate=pl.CostEstimate(
            flops=2 * n_col_pad * d_in_pad * d_out_pad,
            transcendentals=0,
            bytes_accessed=(x_pad.size * cdt.itemsize
                            + w_pad.size * cdt.itemsize
                            + b_pad.size * 4
                            + n_col_pad * d_out_pad * cdt.itemsize),
        ),
    )(x_pad, w_pad, b_pad)

    # --------------------- Phase 2: propagation G @ h -----------------------
    if h_resident:
        out_pad = pl.pallas_call(
            _propagate_resident_kernel,
            out_shape=jax.ShapeDtypeStruct((n_row_pad, d_out_pad), out_dtype),
            grid_spec=pltpu.PrefetchScalarGridSpec(
                num_scalar_prefetch=0,
                grid=(n_row_pad // tm,),
                in_specs=[
                    pl.BlockSpec((tm, n_col_pad), lambda i: (i, 0)),       # G
                    pl.BlockSpec((n_col_pad, d_out_pad), lambda i: (0, 0)),  # h resident
                ],
                out_specs=pl.BlockSpec((tm, d_out_pad), lambda i: (i, 0)),
            ),
            compiler_params=pltpu.CompilerParams(
                dimension_semantics=("parallel",),
                vmem_limit_bytes=vmem_limit,
            ),
            cost_estimate=pl.CostEstimate(
                flops=2 * n_row_pad * n_col_pad * d_out_pad,
                transcendentals=0,
                bytes_accessed=(g_pad.size * cdt.itemsize
                                + n_col_pad * d_out_pad * cdt.itemsize
                                + n_row_pad * d_out_pad * out_itemsize),
            ),
        )(g_pad, h_pad)
    else:
        n_row_tiles = n_row_pad // tm
        n_k = n_col_pad // tk
        in_specs = [
            pl.BlockSpec((tm, tk), lambda i, k: (i, k)),            # G tile
            pl.BlockSpec((tk, d_out_pad), lambda i, k: (k, 0)),     # h tile
        ]
        out_spec = pl.BlockSpec((tm, d_out_pad), lambda i, k: (i, 0))
        common = dict(
            out_shape=jax.ShapeDtypeStruct((n_row_pad, d_out_pad), out_dtype),
            compiler_params=pltpu.CompilerParams(
                dimension_semantics=("parallel", "arbitrary"),
                vmem_limit_bytes=vmem_limit,
            ),
            # h is re-streamed once per row tile in this fallback.
            cost_estimate=pl.CostEstimate(
                flops=2 * n_row_pad * n_col_pad * d_out_pad,
                transcendentals=0,
                bytes_accessed=(g_pad.size * cdt.itemsize
                                + n_row_tiles * n_col_pad * d_out_pad * cdt.itemsize
                                + n_row_pad * d_out_pad * out_itemsize),
            ),
        )
        if jnp.dtype(out_dtype) == jnp.dtype(jnp.float32):
            out_pad = pl.pallas_call(
                _propagate_acc_out_kernel,
                grid_spec=pltpu.PrefetchScalarGridSpec(
                    num_scalar_prefetch=0, grid=(n_row_tiles, n_k),
                    in_specs=in_specs, out_specs=out_spec),
                **common,
            )(g_pad, h_pad)
        else:
            out_pad = pl.pallas_call(
                _propagate_scratch_kernel,
                grid_spec=pltpu.PrefetchScalarGridSpec(
                    num_scalar_prefetch=0, grid=(n_row_tiles, n_k),
                    in_specs=in_specs, out_specs=out_spec,
                    scratch_shapes=[pltpu.VMEM((tm, d_out_pad), jnp.float32)]),
                **common,
            )(g_pad, h_pad)

    return out_pad[:N, :dim_out]


if __name__ == "__main__":
    key = jax.random.PRNGKey(0)
    k_feat, k_w, k_b, k_g = jax.random.split(key, 4)

    # Non-128-aligned sizes to exercise the padding path; tm=128 gives a real
    # multi-row-tile grid for the propagation matmul.
    N, dim_in, dim_out = 200, 48, 30

    feats = jax.random.normal(k_feat, (N, dim_in), dtype=jnp.float32)
    # nn.Linear param shapes: weight [dim_out, dim_in], bias [dim_out]
    weight = jax.random.normal(k_w, (dim_out, dim_in), dtype=jnp.float32) * 0.1
    bias = jax.random.normal(k_b, (dim_out,), dtype=jnp.float32) * 0.1
    # Hypergraph Laplacian-like dense matrix G: [N, N]
    G = jax.random.uniform(k_g, (N, N), dtype=jnp.float32) / N

    # Pure-JAX reference (eval-mode forward, ReLU activation).
    ref = G @ jnp.maximum(feats @ weight.T + bias, 0.0)

    # Default bf16 operand path; the G pad/cast is hoisted (per hypergraph)
    # via pad_graph so the per-forward host-side copy is skipped.
    g_prepared = pad_graph(G, tm=128, dtype=jnp.bfloat16)
    out_bf16 = jax.block_until_ready(
        hgnn_conv(feats, weight, bias, g_prepared, tm=128))
    assert out_bf16.shape == (N, dim_out)
    assert jnp.allclose(out_bf16, ref, atol=3e-2, rtol=3e-2)

    # Strict f32 operand path (raw G; wrapper pads/casts internally).
    out_f32 = jax.block_until_ready(
        hgnn_conv(feats, weight, bias, G, tm=128,
                  compute_dtype=jnp.float32))
    assert out_f32.shape == (N, dim_out)
    assert jnp.allclose(out_f32, ref, atol=1e-4, rtol=1e-4)

    print("KERNEL_OK")
</pallas_src>

<mosaic_0001>
module attributes {stable_mosaic.version = 11 : i64} {
  func.func @_linear_relu_kernel(%arg0: i32, %arg1: memref<256x128xbf16, #tpu.memory_space<vmem>>, %arg2: memref<128x128xbf16, #tpu.memory_space<vmem>>, %arg3: memref<1x128xf32, #tpu.memory_space<vmem>>, %arg4: memref<256x128xbf16, #tpu.memory_space<vmem>>) attributes {dimension_semantics = [#tpu.dimension_semantics<parallel>], iteration_bounds = array<i64: 1>, scalar_prefetch = 0 : i64, scratch_operands = 0 : i64, tpu.core_type = #tpu.core_type<tc>, window_params = [{transform_indices = @transform_0, window_bounds = array<i64: 256, 128>}, {pipeline_mode = #tpu.pipeline_mode<synchronous>, transform_indices = @transform_1, window_bounds = array<i64: 128, 128>}, {pipeline_mode = #tpu.pipeline_mode<synchronous>, transform_indices = @transform_2, window_bounds = array<i64: 1, 128>}, {transform_indices = @transform_3, window_bounds = array<i64: 256, 128>}]} {
    %c0 = arith.constant 0 : index
    %c0_0 = arith.constant 0 : index
    %0 = vector.load %arg1[%c0, %c0_0] : memref<256x128xbf16, #tpu.memory_space<vmem>>, vector<256x128xbf16>
    %c0_1 = arith.constant 0 : index
    %c0_2 = arith.constant 0 : index
    %1 = vector.load %arg2[%c0_1, %c0_2] : memref<128x128xbf16, #tpu.memory_space<vmem>>, vector<128x128xbf16>
    %cst = arith.constant dense<0.000000e+00> : vector<256x128xf32>
    %2 = tpu.matmul %0, %1, %cst {dimension_numbers = #tpu.dot_dimension_numbers<[1], [0], [0], [1], [0, 0, 1, 1], [], []>} : vector<256x128xbf16>, vector<128x128xbf16>, vector<256x128xf32> -> vector<256x128xf32>
    %c0_3 = arith.constant 0 : index
    %c0_4 = arith.constant 0 : index
    %3 = vector.load %arg3[%c0_3, %c0_4] : memref<1x128xf32, #tpu.memory_space<vmem>>, vector<1x128xf32>
    %4 = vector.broadcast %3 : vector<1x128xf32> to vector<256x128xf32>
    %5 = arith.addf %2, %4 : vector<256x128xf32>
    %cst_5 = arith.constant 0.000000e+00 : f32
    %6 = vector.broadcast %cst_5 : f32 to vector<256x128xf32>
    %7 = arith.maximumf %5, %6 : vector<256x128xf32>
    %8 = arith.truncf %7 : vector<256x128xf32> to vector<256x128xbf16>
    %c0_6 = arith.constant 0 : index
    %c0_7 = arith.constant 0 : index
    %9 = vector.load %arg4[%c0_6, %c0_7] : memref<256x128xbf16, #tpu.memory_space<vmem>>, vector<256x128xbf16>
    tpu.vector_store %arg4[%c0_6, %c0_7], %8 {strides = array<i32>} : memref<256x128xbf16, #tpu.memory_space<vmem>>, vector<256x128xbf16>,
    return
  }
  func.func @transform_0(%arg0: i32) -> (i32, i32) {
    %c0_i32 = arith.constant 0 : i32
    %c0_i32_0 = arith.constant 0 : i32
    return %arg0, %c0_i32 : i32, i32
  }
  func.func @transform_1(%arg0: i32) -> (i32, i32) {
    %c0_i32 = arith.constant 0 : i32
    %c0_i32_0 = arith.constant 0 : i32
    %c0_i32_1 = arith.constant 0 : i32
    return %c0_i32, %c0_i32_0 : i32, i32
  }
  func.func @transform_2(%arg0: i32) -> (i32, i32) {
    %c0_i32 = arith.constant 0 : i32
    %c0_i32_0 = arith.constant 0 : i32
    %c0_i32_1 = arith.constant 0 : i32
    return %c0_i32, %c0_i32_0 : i32, i32
  }
  func.func @transform_3(%arg0: i32) -> (i32, i32) {
    %c0_i32 = arith.constant 0 : i32
    %c0_i32_0 = arith.constant 0 : i32
    return %arg0, %c0_i32 : i32, i32
  }
}

</mosaic_0001>

<bundles_post_ra>
// kernel: tpu_custom_call.1
= control target key start
LH: loop header
LB: loop body
LE: loop exit
PB: predicated region body
PF: predicated region fallthrough
CT: control target
= control target key end

     0   :  { %8 = vsyncpa [#allocation3], 0  ;;  %s1094_s0 = inlined_call_operand.hbm [shape: bf16[256,128], index: 0, kind: input, shape index: {}]   ;;  %s1095_s1 = inlined_call_operand.hbm [shape: bf16[128,128], index: 1, kind: input, shape index: {}]   ;;  %s1096_s2 = inlined_call_operand.vmem [shape: f32[1,128], index: 2, kind: input, shape index: {}]   ;;  %s1097_s3 = inlined_call_operand.hbm [shape: bf16[256,128], index: 3, kind: output, shape index: {}]  }
   0x1   :  { %9 = vsyncpa [#allocation6], 0 }
   0x2   :  { %10 = vsyncpa [#allocation4], 0  ;;  %s987_s12 = smov [#allocation2]   ;;  %s915_s16 = scalar_lea.hbm %s1094_s0, 2048 }
   0x3   :  { %s16_s13 = sshll.u32 %s987_s12, 4  ;;  %p916_p0 = scmp.ne.s32.totalorder %s1094_s0, %s915_s16  ;;  %s17_s13 = int_to_ptr.vmem [resolvable:$true] %s16_s13 }
   0x4   :  { %p919_p1 = scmp.lt.u32.totalorder %s915_s16, %s1094_s0 }
   0x6   :  { %p921_p2 = pnand %p919_p1, %p916_p0 }
   0x8   :  { %924 = shalt.err (!%p921_p2)
}
   0x9   :  { %s925_s21 = scalar_lea.vmem %s17_s13, 2048  ;;  %p930_p4 = scmp.lt.s32.totalorder %s17_s13, %s17_s13 }
   0xa   :  { %p926_p3 = scmp.ne.s32.totalorder %s17_s13, %s925_s21  ;;  %p931_p5 = scmp.lt.s32.totalorder %s925_s21, %s925_s21 }
   0xc   :  { %p932_p6 = por %p931_p5, %p930_p4 }
   0xe   :  { %p933_p7 = pnand %p932_p6, %p926_p3 }
  0x10   :  { %936 = shalt.err (!%p933_p7)
}
  0x11   :  { %s988_s22 = smov 64   ;;  %s989_s23 = smov 4  }
  0x12   :  { %22 = dma.hbm_to_vmem [thread:$0]  %s1094_s0, 2048, %s17_s13, [#allocation3], %s988_s22, %s988_s22, %s989_s23  }
  0x13   :  { %s990_s26 = smov [#allocation5]   ;;  %s937_s30 = scalar_lea.hbm %s1095_s1, 1024 }
  0x14   :  { %s28_s27 = sshll.u32 %s990_s26, 4  ;;  %p938_p8 = scmp.ne.s32.totalorder %s1095_s1, %s937_s30  ;;  %s29_s27 = int_to_ptr.vmem [resolvable:$true] %s28_s27 }
  0x15   :  { %p941_p9 = scmp.lt.u32.totalorder %s937_s30, %s1095_s1 }
  0x17   :  { %p943_p10 = pnand %p941_p9, %p938_p8 }
  0x19   :  { %946 = shalt.err (!%p943_p10)
}
  0x1a   :  { %s947_s8 = scalar_lea.vmem %s29_s27, 1024  ;;  %p952_p12 = scmp.lt.s32.totalorder %s29_s27, %s29_s27 }
  0x1b   :  { %p948_p11 = scmp.ne.s32.totalorder %s29_s27, %s947_s8  ;;  %p953_p13 = scmp.lt.s32.totalorder %s947_s8, %s947_s8 }
  0x1d   :  { %p954_p0 = por %p953_p13, %p952_p12 }
  0x1f   :  { %p955_p1 = pnand %p954_p0, %p948_p11 }
  0x21   :  { %958 = shalt.err (!%p955_p1)
}
  0x22   :  { %34 = dma.hbm_to_vmem [thread:$0]  %s1095_s1, 1024, %s29_s27, [#allocation6], %s988_s22, %s988_s22, %s989_s23  }
  0x23   :  { %981 = dma.done.wait [#allocation3], 2048  }
  0x24   :  { %982 = vsyncadd [#allocation3], 4294965248 }
  0x25   :  { %983 = dma.done.wait [#allocation6], 1024  }
  0x26   :  { %984 = vsyncadd [#allocation6], 4294966272  ;;  %v891_v0 = vld [vmem:[#allocation5] sm:$0xff]   ;;  %v892_v1 = vld [vmem:[#allocation5 + $0x8] sm:$0xff]  }
  0x27   :  { %822 = vmatprep.subr.bf16.mxu0 %v891_v0  ;;  %870 = vmatprep.subr.bf16.mxu1 %v891_v0  ;;  %v893_v2 = vld [vmem:[#allocation5 + $0x10] sm:$0xff]   ;;  %v894_v3 = vld [vmem:[#allocation5 + $0x18] sm:$0xff]   ;;  %v899_v4 = vld [vmem:[#allocation2] sm:$0xff]  }
  0x28   :  { %823 = vmatpush3.bf16.msra.mxu0 %v891_v0  ;;  %878 = vmatpush3.bf16.msra.mxu1 %v891_v0  ;;  %v900_v5 = vld [vmem:[#allocation2 + $0x40] sm:$0xff]   ;;  %v896_v7 = vld [vmem:[#allocation5 + $0x28] sm:$0xff]   ;;  %v897_v8 = vld [vmem:[#allocation5 + $0x30] sm:$0xff]  }
  0x29   :  { %824 = vmatprep.subr.bf16.mxu0 %v892_v1  ;;  %871 = vmatprep.subr.bf16.mxu1 %v892_v1  ;;  %v895_v6 = vld [vmem:[#allocation5 + $0x20] sm:$0xff]   ;;  %v898_v9 = vld [vmem:[#allocation5 + $0x38] sm:$0xff]   ;;  %v901_v10 = vld [vmem:[#allocation2 + $0x8] sm:$0xff]  }
  0x2a   :  { %838 = vmatprep.mubr.bf16.mxu0 %v899_v4  ;;  %854 = vmatprep.mubr.bf16.mxu1 %v900_v5  ;;  %v902_v11 = vld [vmem:[#allocation2 + $0x48] sm:$0xff]   ;;  %v903_v12 = vld [vmem:[#allocation2 + $0x10] sm:$0xff]   ;;  %v905_v14 = vld [vmem:[#allocation2 + $0x18] sm:$0xff]  }
  0x2b   :  { %v904_v13 = vld [vmem:[#allocation2 + $0x50] sm:$0xff]   ;;  %v906_v15 = vld [vmem:[#allocation2 + $0x58] sm:$0xff]   ;;  %v907_v16 = vld [vmem:[#allocation2 + $0x20] sm:$0xff]  }
  0x2c   :  { %825 = vmatpush3.bf16.msra.mxu0 %v892_v1  ;;  %879 = vmatpush3.bf16.msra.mxu1 %v892_v1  ;;  %v908_v17 = vld [vmem:[#allocation2 + $0x60] sm:$0xff]   ;;  %v909_v18 = vld [vmem:[#allocation2 + $0x28] sm:$0xff]   ;;  %v911_v20 = vld [vmem:[#allocation2 + $0x30] sm:$0xff]  }
  0x2d   :  { %826 = vmatprep.subr.bf16.mxu0 %v893_v2  ;;  %872 = vmatprep.subr.bf16.mxu1 %v893_v2  ;;  %v910_v19 = vld [vmem:[#allocation2 + $0x68] sm:$0xff]   ;;  %v912_v21 = vld [vmem:[#allocation2 + $0x70] sm:$0xff]   ;;  %v913_v22 = vld [vmem:[#allocation2 + $0x38] sm:$0xff]  }
  0x2e   :  { %v914_v23 = vld [vmem:[#allocation2 + $0x78] sm:$0xff]   ;;  %v1045_v24 = vld [vmem:[%s1096_s2] ss:$0 sm:$0xff]  ;;  %s991_s2 = smov [#allocation7]  }
  0x2f   :  { %s601_s11 = sshll.u32 %s991_s2, 4  ;;  %s602_s11 = int_to_ptr.vmem [resolvable:$true] %s601_s11 }
  0x30   :  { %827 = vmatpush3.bf16.msra.mxu0 %v893_v2  ;;  %880 = vmatpush3.bf16.msra.mxu1 %v893_v2  ;;  %s959_s12 = scalar_lea.vmem %s602_s11, 2048  ;;  %p964_p3 = scmp.lt.s32.totalorder %s602_s11, %s602_s11 }
  0x31   :  { %828 = vmatprep.subr.bf16.mxu0 %v894_v3  ;;  %873 = vmatprep.subr.bf16.mxu1 %v894_v3  ;;  %p960_p2 = scmp.ne.s32.totalorder %s602_s11, %s959_s12  ;;  %p965_p4 = scmp.lt.s32.totalorder %s959_s12, %s959_s12 }
  0x33   :  { %p966_p5 = por %p965_p4, %p964_p3 }
  0x34   :  { %829 = vmatpush3.bf16.msra.mxu0 %v894_v3  ;;  %881 = vmatpush3.bf16.msra.mxu1 %v894_v3 }
  0x35   :  { %830 = vmatprep.subr.bf16.mxu0 %v895_v6  ;;  %874 = vmatprep.subr.bf16.mxu1 %v895_v6  ;;  %p967_p6 = pnand %p966_p5, %p960_p2 }
  0x38   :  { %831 = vmatpush3.bf16.msra.mxu0 %v895_v6  ;;  %882 = vmatpush3.bf16.msra.mxu1 %v895_v6 }
  0x39   :  { %832 = vmatprep.subr.bf16.mxu0 %v896_v7  ;;  %875 = vmatprep.subr.bf16.mxu1 %v896_v7 }
  0x3c   :  { %833 = vmatpush3.bf16.msra.mxu0 %v896_v7  ;;  %883 = vmatpush3.bf16.msra.mxu1 %v896_v7 }
  0x3d   :  { %834 = vmatprep.subr.bf16.mxu0 %v897_v8  ;;  %876 = vmatprep.subr.bf16.mxu1 %v897_v8 }
  0x40   :  { %835 = vmatpush3.bf16.msra.mxu0 %v897_v8  ;;  %884 = vmatpush3.bf16.msra.mxu1 %v897_v8 }
  0x41   :  { %836 = vmatprep.subr.bf16.mxu0 %v898_v9  ;;  %877 = vmatprep.subr.bf16.mxu1 %v898_v9 }
  0x44   :  { %837 = vmatpush3.bf16.msra.mxu0 %v898_v9  ;;  %885 = vmatpush3.bf16.msra.mxu1 %v898_v9 }
  0x47   :  { %839 = vmatmul.mubr.bf16.vlgmr.msra.gmra.mrb[0].mxu0 %v901_v10  ;;  %855 = vmatmul.mubr.bf16.vlgmr.msra.gmra.mrb[0].mxu1 %v902_v11 }
  0x48   :  { %842 = vmatprep.mubr.bf16.mxu0 %v903_v12  ;;  %858 = vmatprep.mubr.bf16.mxu1 %v904_v13 }
  0x4f   :  { %843 = vmatmul.mubr.bf16.gmra.mrb[4].mxu0 %v905_v14  ;;  %859 = vmatmul.mubr.bf16.gmra.mrb[4].mxu1 %v906_v15 }
  0x50   :  { %846 = vmatprep.mubr.bf16.mxu0 %v907_v16  ;;  %862 = vmatprep.mubr.bf16.mxu1 %v908_v17 }
  0x57   :  { %847 = vmatmul.mubr.bf16.gmra.mrb[8].mxu0 %v909_v18  ;;  %863 = vmatmul.mubr.bf16.gmra.mrb[8].mxu1 %v910_v19 }
  0x58   :  { %850 = vmatprep.mubr.bf16.mxu0 %v911_v20  ;;  %866 = vmatprep.mubr.bf16.mxu1 %v912_v21 }
  0x5f   :  { %851 = vmatmul.mubr.bf16.gmra.mrb[12].mxu0 %v913_v22  ;;  %867 = vmatmul.mubr.bf16.gmra.mrb[12].mxu1 %v914_v23 }
 0x11a   :  { %v840_v25 = vpop.f32.mrb[0].mxu0  ;;  %v856_v26 = vpop.f32.mrb[0].mxu1 }
 0x11b   :  { %v286_v27 = vadd.f32 %v840_v25, %v1045_v24  ;;  %v350_v28 = vadd.f32 %v856_v26, %v1045_v24  ;;  %v277_v29 = vpop.f32.mrb[1].mxu0  ;;  %v341_v30 = vpop.f32.mrb[1].mxu1 }
 0x11c   :  { %v278_v31 = vadd.f32 %v1045_v24, %v277_v29  ;;  %v342_v32 = vadd.f32 %v1045_v24, %v341_v30  ;;  %v841_v33 = vpop.f32.mrb[2].mxu0  ;;  %v857_v34 = vpop.f32.mrb[2].mxu1 }
 0x11d   :  { %v289_v35 = vadd.f32 %v841_v33, %v1045_v24  ;;  %v353_v36 = vadd.f32 %v857_v34, %v1045_v24  ;;  %v280_v37 = vpop.f32.mrb[3].mxu0  ;;  %v344_v38 = vpop.f32.mrb[3].mxu1  ;;  %v406_v41 = vmax.f32 %v286_v27, 0.0  ;;  %v422_v42 = vmax.f32 %v350_v28, 0.0 }
 0x11e   :  { %v281_v39 = vadd.f32 %v1045_v24, %v280_v37  ;;  %v345_v40 = vadd.f32 %v1045_v24, %v344_v38  ;;  %v404_v45 = vmax.f32 %v278_v31, 0.0  ;;  %v420_v46 = vmax.f32 %v342_v32, 0.0 }
 0x11f   :  { %v407_v43 = vmax.f32 %v289_v35, 0.0  ;;  %v423_v44 = vmax.f32 %v353_v36, 0.0 }
 0x120   :  { %v405_v47 = vmax.f32 %v281_v39, 0.0  ;;  %v421_v48 = vmax.f32 %v345_v40, 0.0 }
 0x121   :  { %v711_v49 = vpack.c.bf16 %v407_v43, %v406_v41  ;;  %v751_v50 = vpack.c.bf16 %v423_v44, %v422_v42 }
 0x122   :  { %v706_v51 = vpack.c.bf16 %v405_v47, %v404_v45  ;;  %v746_v52 = vpack.c.bf16 %v421_v48, %v420_v46  ;;  %v844_v53 = vpop.f32.mrb[4].mxu0  ;;  %v860_v54 = vpop.f32.mrb[4].mxu1 }
 0x123   :  { %783 = vst [vmem:[#allocation7 + $0x8] sm:$0xff] %v711_v49   ;;  %791 = vst [vmem:[#allocation7 + $0x48] sm:$0xff] %v751_v50   ;;  %v302_v55 = vadd.f32 %v844_v53, %v1045_v24  ;;  %v366_v56 = vadd.f32 %v860_v54, %v1045_v24  ;;  %v293_v57 = vpop.f32.mrb[5].mxu0  ;;  %v357_v58 = vpop.f32.mrb[5].mxu1 }
 0x124   :  { %707 = vst [vmem:[#allocation7] sm:$0xff] %v706_v51   ;;  %790 = vst [vmem:[#allocation7 + $0x40] sm:$0xff] %v746_v52   ;;  %v294_v59 = vadd.f32 %v1045_v24, %v293_v57  ;;  %v358_v60 = vadd.f32 %v1045_v24, %v357_v58  ;;  %v845_v61 = vpop.f32.mrb[6].mxu0  ;;  %v861_v62 = vpop.f32.mrb[6].mxu1 }
 0x125   :  { %v305_v63 = vadd.f32 %v845_v61, %v1045_v24  ;;  %v369_v0 = vadd.f32 %v861_v62, %v1045_v24  ;;  %v296_v1 = vpop.f32.mrb[7].mxu0  ;;  %v360_v2 = vpop.f32.mrb[7].mxu1  ;;  %v410_v5 = vmax.f32 %v302_v55, 0.0  ;;  %v426_v6 = vmax.f32 %v366_v56, 0.0 }
 0x126   :  { %v297_v3 = vadd.f32 %v1045_v24, %v296_v1  ;;  %v361_v4 = vadd.f32 %v1045_v24, %v360_v2  ;;  %v408_v9 = vmax.f32 %v294_v59, 0.0  ;;  %v424_v10 = vmax.f32 %v358_v60, 0.0 }
 0x127   :  { %v411_v7 = vmax.f32 %v305_v63, 0.0  ;;  %v427_v8 = vmax.f32 %v369_v0, 0.0 }
 0x128   :  { %v409_v11 = vmax.f32 %v297_v3, 0.0  ;;  %v425_v12 = vmax.f32 %v361_v4, 0.0 }
 0x129   :  { %v721_v13 = vpack.c.bf16 %v411_v7, %v410_v5  ;;  %v761_v14 = vpack.c.bf16 %v427_v8, %v426_v6 }
 0x12a   :  { %v716_v15 = vpack.c.bf16 %v409_v11, %v408_v9  ;;  %v756_v16 = vpack.c.bf16 %v425_v12, %v424_v10  ;;  %v848_v17 = vpop.f32.mrb[8].mxu0  ;;  %v864_v18 = vpop.f32.mrb[8].mxu1 }
 0x12b   :  { %785 = vst [vmem:[#allocation7 + $0x18] sm:$0xff] %v721_v13   ;;  %793 = vst [vmem:[#allocation7 + $0x58] sm:$0xff] %v761_v14   ;;  %v318_v19 = vadd.f32 %v848_v17, %v1045_v24  ;;  %v382_v20 = vadd.f32 %v864_v18, %v1045_v24  ;;  %v309_v21 = vpop.f32.mrb[9].mxu0  ;;  %v373_v22 = vpop.f32.mrb[9].mxu1 }
 0x12c   :  { %784 = vst [vmem:[#allocation7 + $0x10] sm:$0xff] %v716_v15   ;;  %792 = vst [vmem:[#allocation7 + $0x50] sm:$0xff] %v756_v16   ;;  %v310_v23 = vadd.f32 %v1045_v24, %v309_v21  ;;  %v374_v25 = vadd.f32 %v1045_v24, %v373_v22  ;;  %v849_v26 = vpop.f32.mrb[10].mxu0  ;;  %v865_v27 = vpop.f32.mrb[10].mxu1 }
 0x12d   :  { %v321_v28 = vadd.f32 %v849_v26, %v1045_v24  ;;  %v385_v29 = vadd.f32 %v865_v27, %v1045_v24  ;;  %v312_v30 = vpop.f32.mrb[11].mxu0  ;;  %v376_v31 = vpop.f32.mrb[11].mxu1  ;;  %v414_v34 = vmax.f32 %v318_v19, 0.0  ;;  %v430_v35 = vmax.f32 %v382_v20, 0.0 }
 0x12e   :  { %v313_v32 = vadd.f32 %v1045_v24, %v312_v30  ;;  %v377_v33 = vadd.f32 %v1045_v24, %v376_v31  ;;  %v412_v38 = vmax.f32 %v310_v23, 0.0  ;;  %v428_v39 = vmax.f32 %v374_v25, 0.0 }
 0x12f   :  { %v415_v36 = vmax.f32 %v321_v28, 0.0  ;;  %v431_v37 = vmax.f32 %v385_v29, 0.0 }
 0x130   :  { %v413_v40 = vmax.f32 %v313_v32, 0.0  ;;  %v429_v41 = vmax.f32 %v377_v33, 0.0 }
 0x131   :  { %v731_v42 = vpack.c.bf16 %v415_v36, %v414_v34  ;;  %v771_v43 = vpack.c.bf16 %v431_v37, %v430_v35 }
 0x132   :  { %v726_v44 = vpack.c.bf16 %v413_v40, %v412_v38  ;;  %v766_v45 = vpack.c.bf16 %v429_v41, %v428_v39  ;;  %v852_v46 = vpop.f32.mrb[12].mxu0  ;;  %v868_v47 = vpop.f32.mrb[12].mxu1 }
 0x133   :  { %787 = vst [vmem:[#allocation7 + $0x28] sm:$0xff] %v731_v42   ;;  %795 = vst [vmem:[#allocation7 + $0x68] sm:$0xff] %v771_v43   ;;  %v334_v48 = vadd.f32 %v852_v46, %v1045_v24  ;;  %v398_v49 = vadd.f32 %v868_v47, %v1045_v24  ;;  %v325_v50 = vpop.f32.mrb[13].mxu0  ;;  %v389_v51 = vpop.f32.mrb[13].mxu1 }
 0x134   :  { %786 = vst [vmem:[#allocation7 + $0x20] sm:$0xff] %v726_v44   ;;  %794 = vst [vmem:[#allocation7 + $0x60] sm:$0xff] %v766_v45   ;;  %v326_v52 = vadd.f32 %v1045_v24, %v325_v50  ;;  %v390_v53 = vadd.f32 %v1045_v24, %v389_v51  ;;  %v853_v54 = vpop.f32.mrb[14].mxu0  ;;  %v869_v55 = vpop.f32.mrb[14].mxu1 }
 0x135   :  { %v337_v56 = vadd.f32 %v853_v54, %v1045_v24  ;;  %v401_v57 = vadd.f32 %v869_v55, %v1045_v24  ;;  %v328_v58 = vpop.f32.mrb[15].mxu0  ;;  %v392_v59 = vpop.f32.mrb[15].mxu1  ;;  %v418_v62 = vmax.f32 %v334_v48, 0.0  ;;  %v434_v63 = vmax.f32 %v398_v49, 0.0 }
 0x136   :  { %v329_v60 = vadd.f32 %v1045_v24, %v328_v58  ;;  %v393_v61 = vadd.f32 %v1045_v24, %v392_v59  ;;  %v416_v2 = vmax.f32 %v326_v52, 0.0  ;;  %v432_v3 = vmax.f32 %v390_v53, 0.0 }
 0x137   :  { %v419_v0 = vmax.f32 %v337_v56, 0.0  ;;  %v435_v1 = vmax.f32 %v401_v57, 0.0 }
 0x138   :  { %v417_v4 = vmax.f32 %v329_v60, 0.0  ;;  %v433_v5 = vmax.f32 %v393_v61, 0.0 }
 0x139   :  { %v741_v6 = vpack.c.bf16 %v419_v0, %v418_v62  ;;  %v781_v7 = vpack.c.bf16 %v435_v1, %v434_v63 }
 0x13a   :  { %v736_v8 = vpack.c.bf16 %v417_v4, %v416_v2  ;;  %v776_v9 = vpack.c.bf16 %v433_v5, %v432_v3 }
 0x13b   :  { %789 = vst [vmem:[#allocation7 + $0x38] sm:$0xff] %v741_v6   ;;  %797 = vst [vmem:[#allocation7 + $0x78] sm:$0xff] %v781_v7  }
 0x13c   :  { %788 = vst [vmem:[#allocation7 + $0x30] sm:$0xff] %v736_v8   ;;  %796 = vst [vmem:[#allocation7 + $0x70] sm:$0xff] %v776_v9  }
 0x13d   :  { %970 = shalt.err (!%p967_p6)
}
 0x13e   :  { %s971_s15 = scalar_lea.hbm %s1097_s3, 2048 }
 0x13f   :  { %p972_p7 = scmp.ne.s32.totalorder %s1097_s3, %s971_s15  ;;  %p975_p8 = scmp.lt.u32.totalorder %s971_s15, %s1097_s3 }
 0x141   :  { %p977_p9 = pnand %p975_p8, %p972_p7 }
 0x143   :  { %980 = shalt.err (!%p977_p9)
}
 0x144   :  { %607 = dma.vmem_to_hbm [thread:$0]  %s602_s11, 2048, %s1097_s3, [#allocation4], %s988_s22, %s988_s22, %s989_s23  }
 0x145   :  { %985 = dma.done.wait [#allocation4], 2048  }
 0x146   :  { %986 = vsyncadd [#allocation4], 4294965248 }
 0x147   :  { %611 = vsyncpa [#allocation3], 1 }
 0x148   :  { %612 = vsyncpa [#allocation6], 1 }
 0x149   :  { %613 = vsyncpa [#allocation4], 1 }

</bundles_post_ra>
